<compile_context>
chip_gen: v7x
topology: tpu7x:2x2x1
jax: 0.10.0
libtpu: 0.0.40
codegen_flags: <defaults>
</compile_context>

<pallas_src>
import functools

import jax
import jax.numpy as jnp
from jax import lax
from jax.experimental import pallas as pl
from jax.experimental.pallas import tpu as pltpu


def _round_up(x: int, m: int) -> int:
    return ((x + m - 1) // m) * m


def _linear_module_kernel(x_ref, v_ref, w_ref, b_ref, o_ref):
    # x_ref: (TB, D)        batch tile of semantic vectors
    # v_ref: (1, D)         vertice (VMEM-resident across grid)
    # w_ref: (OUT_pad, D)   PyTorch-layout weight, zero-padded rows (VMEM-resident)
    # b_ref: (1, OUT_pad)   zero-padded bias (VMEM-resident)
    # o_ref: (TB, OUT_pad)  lane-dense output tile (OUT_pad % 128 == 0)
    x_off = x_ref[...] - v_ref[...]                       # VPU broadcast subtract
    y = lax.dot_general(                                   # MXU: contract D of both operands
        x_off, w_ref[...],
        dimension_numbers=(((1,), (1,)), ((), ())),        # no wrapper-side transpose needed
        preferred_element_type=jnp.float32)                # (TB, OUT_pad), f32 accumulate
    o_ref[...] = jnp.maximum(y + b_ref[...], 0.0)          # bias + ReLU, unmasked full-lane store


def prepare_linear_params(weight, bias):
    """One-time (parameter-load-time) prep.

    Keeps PyTorch (out_dim, D) layout (no transpose) and zero-pads out_dim up to a
    multiple of 128 so the kernel's output/store path is lane-dense. Do this once,
    not per forward call."""
    out_dim, d = weight.shape
    out_pad = _round_up(out_dim, 128)
    w_pad = jnp.zeros((out_pad, d), jnp.float32).at[:out_dim, :].set(
        weight.astype(jnp.float32))
    b_pad = jnp.zeros((1, out_pad), jnp.float32).at[0, :out_dim].set(
        bias.astype(jnp.float32))
    return w_pad, b_pad


@functools.partial(jax.jit, static_argnames=("out_dim",))
def linear_module_forward(semantic_vec, vertice, w_pad, b_pad, *, out_dim):
    """semantic_vec: (B, D), vertice: (D,), w_pad: (OUT_pad, D), b_pad: (1, OUT_pad)."""
    B, D = semantic_vec.shape
    out_pad = w_pad.shape[0]

    # Batch tile: multiple of 8 sublanes (pads tiny B=2 up to a full-sublane tile),
    # capped at 512 rows so large batches stream through the BlockSpec pipeline
    # (~85% of HBM roofline) and tiles still fit v7x's 64 MiB physical VMEM.
    tb = min(512, _round_up(B, 8))
    rows_pad = _round_up(B, tb)

    x = semantic_vec.astype(jnp.float32)
    if rows_pad != B:
        x = jnp.pad(x, ((0, rows_pad - B), (0, 0)))        # zero rows, sliced off below
    v = vertice.reshape(1, D).astype(jnp.float32)

    grid = (rows_pad // tb,)

    # Explicit VMEM budget: double-buffered x/out tiles + resident weight/vertice/bias,
    # with generous headroom; clamped to a value that is safe on v5e/v6e/v7x.
    vmem_bytes = 4 * (2 * tb * D + 2 * tb * out_pad + out_pad * D + out_pad + D)
    vmem_bytes = min(max(2 * vmem_bytes, 4 << 20), 32 << 20)

    out = pl.pallas_call(
        _linear_module_kernel,
        out_shape=jax.ShapeDtypeStruct((rows_pad, out_pad), jnp.float32),
        grid_spec=pltpu.PrefetchScalarGridSpec(
            num_scalar_prefetch=0,
            grid=grid,
            in_specs=[
                pl.BlockSpec((tb, D), lambda i: (i, 0)),         # batch tile (streamed)
                pl.BlockSpec((1, D), lambda i: (0, 0)),          # vertice: VMEM-resident
                pl.BlockSpec((out_pad, D), lambda i: (0, 0)),    # weight:  VMEM-resident
                pl.BlockSpec((1, out_pad), lambda i: (0, 0)),    # bias:    VMEM-resident
            ],
            out_specs=pl.BlockSpec((tb, out_pad), lambda i: (i, 0)),
        ),
        compiler_params=pltpu.CompilerParams(
            dimension_semantics=("parallel",),   # v7x: shard batch tiles across 2 TCs
            vmem_limit_bytes=vmem_bytes,
        ),
    )(x, v, w_pad, b_pad)

    # Strip batch padding and lane padding (padded weight rows are zero -> relu -> zero).
    return out[:B, :out_dim]


if __name__ == "__main__":
    # Shapes implied by the module: vertice has D elements, fc: D -> out_dim.
    B, D, OUT = 2, 32, 16

    key = jax.random.PRNGKey(0)
    k_vert, k_x, k_w, k_b = jax.random.split(key, 4)

    vertice = jax.random.normal(k_vert, (D,), dtype=jnp.float32)
    semantic_vec = jax.random.normal(k_x, (B, D), dtype=jnp.float32)

    # Deterministic parameter init mirroring nn.Linear's uniform(-1/sqrt(D), 1/sqrt(D)).
    bound = 1.0 / jnp.sqrt(jnp.float32(D))
    weight = jax.random.uniform(k_w, (OUT, D), minval=-bound, maxval=bound,
                                dtype=jnp.float32)
    bias = jax.random.uniform(k_b, (OUT,), minval=-bound, maxval=bound,
                              dtype=jnp.float32)

    # Parameter-load-time prep (padding to lane-dense out_dim; no transpose).
    w_pad, b_pad = prepare_linear_params(weight, bias)

    out = linear_module_forward(semantic_vec, vertice, w_pad, b_pad, out_dim=OUT)
    out = jax.block_until_ready(out)

    # Pure-JAX reference check of the fused kernel.
    ref = jnp.maximum((semantic_vec - vertice) @ weight.T + bias, 0.0)
    assert out.shape == (B, OUT)
    assert jnp.allclose(out, ref, atol=1e-5, rtol=1e-5)

    print("KERNEL_OK")
</pallas_src>

<mosaic_0001>
module attributes {stable_mosaic.version = 11 : i64} {
  func.func @_linear_module_kernel(%arg0: i32, %arg1: memref<8x32xf32, #tpu.memory_space<vmem>>, %arg2: memref<1x32xf32, #tpu.memory_space<vmem>>, %arg3: memref<128x32xf32, #tpu.memory_space<vmem>>, %arg4: memref<1x128xf32, #tpu.memory_space<vmem>>, %arg5: memref<8x128xf32, #tpu.memory_space<vmem>>) attributes {dimension_semantics = [#tpu.dimension_semantics<parallel>], iteration_bounds = array<i64: 1>, scalar_prefetch = 0 : i64, scratch_operands = 0 : i64, tpu.core_type = #tpu.core_type<tc>, window_params = [{transform_indices = @transform_0, window_bounds = array<i64: 8, 32>}, {pipeline_mode = #tpu.pipeline_mode<synchronous>, transform_indices = @transform_1, window_bounds = array<i64: 1, 32>}, {pipeline_mode = #tpu.pipeline_mode<synchronous>, transform_indices = @transform_2, window_bounds = array<i64: 128, 32>}, {pipeline_mode = #tpu.pipeline_mode<synchronous>, transform_indices = @transform_3, window_bounds = array<i64: 1, 128>}, {transform_indices = @transform_4, window_bounds = array<i64: 8, 128>}]} {
    %c0 = arith.constant 0 : index
    %c0_0 = arith.constant 0 : index
    %0 = vector.load %arg1[%c0, %c0_0] : memref<8x32xf32, #tpu.memory_space<vmem>>, vector<8x32xf32>
    %c0_1 = arith.constant 0 : index
    %c0_2 = arith.constant 0 : index
    %1 = vector.load %arg2[%c0_1, %c0_2] : memref<1x32xf32, #tpu.memory_space<vmem>>, vector<1x32xf32>
    %2 = vector.broadcast %1 : vector<1x32xf32> to vector<8x32xf32>
    %3 = arith.subf %0, %2 : vector<8x32xf32>
    %c0_3 = arith.constant 0 : index
    %c0_4 = arith.constant 0 : index
    %4 = vector.load %arg3[%c0_3, %c0_4] : memref<128x32xf32, #tpu.memory_space<vmem>>, vector<128x32xf32>
    %cst = arith.constant dense<0.000000e+00> : vector<8x128xf32>
    %5 = tpu.matmul %3, %4, %cst {dimension_numbers = #tpu.dot_dimension_numbers<[1], [1], [0], [0], [0, 0, 1, 0], [], []>} : vector<8x32xf32>, vector<128x32xf32>, vector<8x128xf32> -> vector<8x128xf32>
    %c0_5 = arith.constant 0 : index
    %c0_6 = arith.constant 0 : index
    %6 = vector.load %arg4[%c0_5, %c0_6] : memref<1x128xf32, #tpu.memory_space<vmem>>, vector<1x128xf32>
    %7 = vector.broadcast %6 : vector<1x128xf32> to vector<8x128xf32>
    %8 = arith.addf %5, %7 : vector<8x128xf32>
    %cst_7 = arith.constant 0.000000e+00 : f32
    %9 = vector.broadcast %cst_7 : f32 to vector<8x128xf32>
    %10 = arith.maximumf %8, %9 : vector<8x128xf32>
    %c0_8 = arith.constant 0 : index
    %c0_9 = arith.constant 0 : index
    %11 = vector.load %arg5[%c0_8, %c0_9] : memref<8x128xf32, #tpu.memory_space<vmem>>, vector<8x128xf32>
    tpu.vector_store %arg5[%c0_8, %c0_9], %10 {strides = array<i32>} : memref<8x128xf32, #tpu.memory_space<vmem>>, vector<8x128xf32>,
    return
  }
  func.func @transform_0(%arg0: i32) -> (i32, i32) {
    %c0_i32 = arith.constant 0 : i32
    %c0_i32_0 = arith.constant 0 : i32
    return %arg0, %c0_i32 : i32, i32
  }
  func.func @transform_1(%arg0: i32) -> (i32, i32) {
    %c0_i32 = arith.constant 0 : i32
    %c0_i32_0 = arith.constant 0 : i32
    %c0_i32_1 = arith.constant 0 : i32
    return %c0_i32, %c0_i32_0 : i32, i32
  }
  func.func @transform_2(%arg0: i32) -> (i32, i32) {
    %c0_i32 = arith.constant 0 : i32
    %c0_i32_0 = arith.constant 0 : i32
    %c0_i32_1 = arith.constant 0 : i32
    return %c0_i32, %c0_i32_0 : i32, i32
  }
  func.func @transform_3(%arg0: i32) -> (i32, i32) {
    %c0_i32 = arith.constant 0 : i32
    %c0_i32_0 = arith.constant 0 : i32
    %c0_i32_1 = arith.constant 0 : i32
    return %c0_i32, %c0_i32_0 : i32, i32
  }
  func.func @transform_4(%arg0: i32) -> (i32, i32) {
    %c0_i32 = arith.constant 0 : i32
    %c0_i32_0 = arith.constant 0 : i32
    return %arg0, %c0_i32 : i32, i32
  }
}

</mosaic_0001>

<bundles_post_ra>
// kernel: linear_module_forward.1
= control target key start
LH: loop header
LB: loop body
LE: loop exit
PB: predicated region body
PF: predicated region fallthrough
CT: control target
= control target key end

     0   :  { %vm49_vm0 = vcmask 261120   ;;  %v283_v0 = vmov 0.0|0.0   ;;  %vm284_vm2 = vmmov 0   ;;  %v285_v4 = vmov 0.0   ;;  %s394_s2 = inlined_call_operand.vmem [shape: f32[128,32], index: 2, kind: input, shape index: {}]   ;;  %s395_s0 = inlined_call_operand.vmem [shape: f32[8,32], index: 0, kind: input, shape index: {}]   ;;  %s396_s1 = inlined_call_operand.vmem [shape: f32[1,32], index: 1, kind: input, shape index: {}]   ;;  %s397_s3 = inlined_call_operand.vmem [shape: f32[1,128], index: 3, kind: input, shape index: {}]   ;;  %s398_s4 = inlined_call_operand.vmem [shape: f32[8,128], index: 4, kind: output, shape index: {}]  }
   0x1   :  { %248 = vmatprep.subr.bf16.mxu0 %v283_v0  ;;  %v26_v1 = vld [vmem:[%s394_s2] sm:$0xff]  ;;  %v27_v2 = vld [vmem:[%s394_s2 + $0x8] sm:$0xff]  ;;  %vm319_vm1 = vmpackc.low %vm49_vm0, %vm49_vm0  ;;  %245 = vmatprep.mubr.msk.f32.mxu0 %vm284_vm2, %v285_v4 }
   0x2   :  { %v249_v5 = vpack.c.bf16 %v27_v2, %v26_v1  ;;  %v28_v6 = vld [vmem:[%s394_s2 + $0x10] sm:$0xff]  ;;  %v29_v7 = vld [vmem:[%s394_s2 + $0x18] sm:$0xff]  ;;  %v30_v9 = vld [vmem:[%s394_s2 + $0x20] sm:$0xff] }
   0x3   :  { %v253_v8 = vpack.c.bf16 %v29_v7, %v28_v6  ;;  %v31_v10 = vld [vmem:[%s394_s2 + $0x28] sm:$0xff]  ;;  %v32_v12 = vld [vmem:[%s394_s2 + $0x30] sm:$0xff]  ;;  %v33_v13 = vld [vmem:[%s394_s2 + $0x38] sm:$0xff] }
   0x4   :  { %251 = vmatpush3.bf16.xpose.msk.msra.mxu0 %vm319_vm1, %v249_v5  ;;  %v257_v11 = vpack.c.bf16 %v31_v10, %v30_v9  ;;  %v261_v14 = vpack.c.bf16 %v33_v13, %v32_v12  ;;  %v34_v15 = vld [vmem:[%s394_s2 + $0x40] sm:$0xff]  ;;  %v35_v16 = vld [vmem:[%s394_s2 + $0x48] sm:$0xff]  ;;  %v36_v18 = vld [vmem:[%s394_s2 + $0x50] sm:$0xff] }
   0x5   :  { %252 = vmatprep.subr.bf16.mxu0 %v283_v0  ;;  %v265_v17 = vpack.c.bf16 %v35_v16, %v34_v15  ;;  %v37_v19 = vld [vmem:[%s394_s2 + $0x58] sm:$0xff]  ;;  %v38_v21 = vld [vmem:[%s394_s2 + $0x60] sm:$0xff]  ;;  %v39_v22 = vld [vmem:[%s394_s2 + $0x68] sm:$0xff] }
   0x6   :  { %v269_v20 = vpack.c.bf16 %v37_v19, %v36_v18  ;;  %v273_v23 = vpack.c.bf16 %v39_v22, %v38_v21  ;;  %v40_v24 = vld [vmem:[%s394_s2 + $0x70] sm:$0xff]  ;;  %v41_v25 = vld [vmem:[%s394_s2 + $0x78] sm:$0xff]  ;;  %v17_v27 = vld [vmem:[%s395_s0] sm:$0xff] }
   0x7   :  { %v277_v26 = vpack.c.bf16 %v41_v25, %v40_v24  ;;  %v177_v28 = vld [vmem:[%s396_s1] ss:$0 sm:$0xff] }
   0x8   :  { %v25_v29 = vsub.f32 %v17_v27, %v177_v28  ;;  %v178_v30 = vld [vmem:[%s397_s3] ss:$0 sm:$0xff] }
   0xc   :  { %255 = vmatpush3.bf16.xpose.msk.msra.mxu0 %vm319_vm1, %v253_v8 }
   0xd   :  { %256 = vmatprep.subr.bf16.mxu0 %v283_v0 }
  0x14   :  { %259 = vmatpush3.bf16.xpose.msk.msra.mxu0 %vm319_vm1, %v257_v11 }
  0x15   :  { %260 = vmatprep.subr.bf16.mxu0 %v283_v0 }
  0x1c   :  { %263 = vmatpush3.bf16.xpose.msk.msra.mxu0 %vm319_vm1, %v261_v14 }
  0x1d   :  { %264 = vmatprep.subr.bf16.mxu0 %v283_v0 }
  0x24   :  { %267 = vmatpush3.bf16.xpose.msk.msra.mxu0 %vm319_vm1, %v265_v17 }
  0x25   :  { %268 = vmatprep.subr.bf16.mxu0 %v283_v0 }
  0x2c   :  { %271 = vmatpush3.bf16.xpose.msk.msra.mxu0 %vm319_vm1, %v269_v20 }
  0x2d   :  { %272 = vmatprep.subr.bf16.mxu0 %v283_v0 }
  0x34   :  { %275 = vmatpush3.bf16.xpose.msk.msra.mxu0 %vm319_vm1, %v273_v23 }
  0x35   :  { %276 = vmatprep.subr.bf16.mxu0 %v283_v0 }
  0x3c   :  { %279 = vmatpush3.bf16.xpose.msk.msra.mxu0 %vm319_vm1, %v277_v26 }
  0x43   :  { %246 = vmatmul.mubr.msk.f32.vlgmr.msra.gmra.mrb[0].mxu0 %vm49_vm0, %v25_v29 }
 0x116   :  { %v167_v31 = vpop.f32.mrb[0].mxu0 }
 0x117   :  { %v168_v32 = vadd.f32 %v178_v30, %v167_v31  ;;  %v247_v33 = vpop.f32.mrb[1].mxu0 }
 0x119   :  { %v171_v34 = vmax.f32 %v168_v32, 0.0 }
 0x11b   :  { %172 = vst [vmem:[%s398_s4] sm:$0xff] %v171_v34 }

</bundles_post_ra>
